<compile_context>
chip_gen: v6e
topology: v6e:2x2x1
jax: 0.10.0
libtpu: 0.0.40
codegen_flags: <defaults>
</compile_context>

<pallas_src>
import functools

import jax
import jax.numpy as jnp
import numpy as np
from jax import lax
from jax.experimental import pallas as pl
from jax.experimental.pallas import tpu as pltpu


# --------------------------------- kernels -----------------------------------

def _avgpool_kernel(p_ref, o_ref):
    # Mean of the 4 stride-2 phases == 2x2 / stride-2 average pool (pure VPU).
    o_ref[0] = 0.25 * (p_ref[0, 0] + p_ref[1, 0] + p_ref[2, 0] + p_ref[3, 0])


def _conv_kernel(p_ref, w_ref, b_ref, o_ref, patch_ref, *, Ho, Wo, C):
    """3x3 / stride-2 / pad-1 conv on the phase-split layout.

    p_ref     : (4, 1, HWo, C) the four stride-2 phases of one sample.
    patch_ref : VMEM scratch (HWo, 9*C) im2col patch matrix; (re)built only on
                the first output-channel tile (j == 0) of each sample and
                reused across output-channel tiles (grid axis 1, "arbitrary").
    """
    j = pl.program_id(1)
    hwo = Ho * Wo

    @pl.when(j == 0)
    def _build_patches():
        # Boundary masks: computed once per sample, shared by all 9 taps.
        q = lax.broadcasted_iota(jnp.int32, (hwo, 1), 0)
        top_ok = (q // Wo) >= 1          # output row 0 has no input row above
        left_ok = (q % Wo) >= 1          # output col 0 has no input col left
        both_ok = top_ok & left_ok

        for tap in range(9):             # tap = ky*3 + kx ; (dy, dx) = (ky-1, kx-1)
            dy, dx = tap // 3 - 1, tap % 3 - 1
            ry, rx = int(dy != 0), int(dx != 0)                  # source phase
            shift = (Wo if dy == -1 else 0) + (1 if dx == -1 else 0)
            chunk = p_ref[ry * 2 + rx, 0]                        # (HWo, C)
            if shift:
                chunk = pltpu.roll(chunk, shift=shift, axis=0)   # XLU rotate
            if dy == -1 and dx == -1:
                chunk = jnp.where(both_ok, chunk, 0.0)
            elif dy == -1:
                chunk = jnp.where(top_ok, chunk, 0.0)
            elif dx == -1:
                chunk = jnp.where(left_ok, chunk, 0.0)
            # Stream each tap straight into its slice of the patch scratch
            # (lane-aligned whenever C % 128 == 0; avoids a (HWo, 9C) temp).
            patch_ref[:, tap * C:(tap + 1) * C] = chunk.astype(patch_ref.dtype)

    # One wide-K MXU matmul: (HWo, 9C) @ (9C, TC), f32 accumulation.
    acc = jnp.dot(patch_ref[...], w_ref[...], preferred_element_type=jnp.float32)
    o_ref[0] = (acc + b_ref[...]).astype(o_ref.dtype)


# --------------------------------- wrapper ------------------------------------

def _split_phases(x_nchw):
    """NCHW -> (4, N, Ho*Wo, C) stride-2 phases, channels on lanes.

    Single transpose; phases[ry*2+rx, n, oh*Wo+ow, c] = x[n, c, 2*oh+ry, 2*ow+rx].
    """
    N, C, H, W = x_nchw.shape
    Ho, Wo = H // 2, W // 2
    x = x_nchw.reshape(N, C, Ho, 2, Wo, 2)
    x = jnp.transpose(x, (3, 5, 0, 2, 4, 1))          # (ry, rx, N, Ho, Wo, C)
    phases = x.reshape(4, N, Ho * Wo, C).astype(jnp.float32)
    return phases, Ho, Wo


def downsample_forward(x_nchw, params=None, *, use_conv, dims=2,
                       mxu_dtype=jnp.float32):
    """Forward pass of the PyTorch Downsample module (stride-2, dims=2)."""
    if dims != 2:
        raise NotImplementedError("only dims=2 implemented")  # TODO(synk)
    N, C, H, W = x_nchw.shape
    assert H % 2 == 0 and W % 2 == 0, "even H, W required"     # TODO(synk)
    if use_conv:
        assert params is not None
        assert params["w"].shape[0] == params["w"].shape[1] == C  # in==out==channels

    phases, Ho, Wo = _split_phases(x_nchw)
    HWo = Ho * Wo

    if not use_conv:
        # -------------------- AvgPool2d(kernel=2, stride=2) --------------------
        # Cap each row-block so (phases + out) * double-buffer fits the default
        # scoped VMEM limit even on v5e: TM * C * 4B <= 1 MiB.
        tm_cap = max(8, ((1 << 20) // (4 * C)) // 8 * 8)
        TM = HWo if HWo <= tm_cap else tm_cap
        grid = (N, pl.cdiv(HWo, TM))
        out_flat = pl.pallas_call(
            _avgpool_kernel,
            out_shape=jax.ShapeDtypeStruct((N, HWo, C), jnp.float32),
            grid_spec=pltpu.PrefetchScalarGridSpec(
                num_scalar_prefetch=0, grid=grid,
                in_specs=[pl.BlockSpec((4, 1, TM, C), lambda b, r: (0, b, r, 0))],
                out_specs=pl.BlockSpec((1, TM, C), lambda b, r: (b, r, 0))),
            compiler_params=pltpu.CompilerParams(
                dimension_semantics=("parallel", "parallel"),
                vmem_limit_bytes=32 << 20),
        )(phases)
    else:
        # ------------------ Conv2d(C, C, 3, stride=2, padding=1) ----------------
        w_oihw = params["w"].astype(jnp.float32)
        bias = params["b"].reshape(1, C).astype(jnp.float32)
        # (O, I, 3, 3) -> (ky, kx, I, O) -> (9*I, O): matches tap-major patches.
        w_slab = jnp.transpose(w_oihw, (2, 3, 1, 0)).reshape(9 * C, C)
        w_slab = w_slab.astype(mxu_dtype)

        # Output-channel tiling: only needed to bound the weight-tile VMEM for
        # very wide layers (the j axis is "arbitrary" so it is not a megacore
        # lever); prefer the widest lane-dense tile.
        if C <= 256 or C % 128 != 0:
            TC = C
        elif C % 256 == 0:
            TC = 256
        else:
            TC = 128
        grid = (N, C // TC)

        kernel = functools.partial(_conv_kernel, Ho=Ho, Wo=Wo, C=C)

        mxu_bytes = jnp.dtype(mxu_dtype).itemsize
        est_bytes = (4 * HWo * C * 4 + HWo * TC * 4) * 2      # phases + out, dbl-buf
        est_bytes += 9 * C * TC * mxu_bytes * 2               # weight tiles
        est_bytes += HWo * 9 * C * mxu_bytes                  # patch scratch
        vmem_limit = int(min(max(int(1.5 * est_bytes), 32 << 20), 64 << 20))

        out_flat = pl.pallas_call(
            kernel,
            out_shape=jax.ShapeDtypeStruct((N, HWo, C), jnp.float32),
            grid_spec=pltpu.PrefetchScalarGridSpec(
                num_scalar_prefetch=0, grid=grid,
                in_specs=[pl.BlockSpec((4, 1, HWo, C), lambda b, j: (0, b, 0, 0)),
                          pl.BlockSpec((9 * C, TC), lambda b, j: (0, j)),
                          pl.BlockSpec((1, TC), lambda b, j: (0, j))],
                out_specs=pl.BlockSpec((1, HWo, TC), lambda b, j: (b, 0, j)),
                scratch_shapes=[pltpu.VMEM((HWo, 9 * C), mxu_dtype)]),
            compiler_params=pltpu.CompilerParams(
                dimension_semantics=("parallel", "arbitrary"),
                vmem_limit_bytes=vmem_limit),
        )(phases, w_slab, bias)

    out = out_flat.reshape(N, Ho, Wo, C)
    return jnp.transpose(out, (0, 3, 1, 2)).astype(x_nchw.dtype)   # back to NCHW


# -------------------------------- reference -----------------------------------

def downsample_reference(x, params, use_conv):
    """Pure-JAX reference mirroring the PyTorch forward."""
    if not use_conv:
        N, C, H, W = x.shape
        return x.reshape(N, C, H // 2, 2, W // 2, 2).mean(axis=(3, 5))
    y = lax.conv_general_dilated(
        x, params["w"], window_strides=(2, 2), padding=((1, 1), (1, 1)),
        dimension_numbers=("NCHW", "OIHW", "NCHW"),
        precision=lax.Precision.HIGHEST)
    return y + params["b"].reshape(1, -1, 1, 1)


# ----------------------------------- main --------------------------------------

if __name__ == "__main__":
    N, C, H, W = 2, 4, 16, 16
    key = jax.random.PRNGKey(0)
    kx, kw, kb = jax.random.split(key, 3)
    x = jax.random.normal(kx, (N, C, H, W), jnp.float32)
    params = dict(
        w=0.1 * jax.random.normal(kw, (C, C, 3, 3), jnp.float32),
        b=0.1 * jax.random.normal(kb, (C,), jnp.float32),
    )

    # --- use_conv=False: stride-2 average pool ---
    out_pool = jax.block_until_ready(downsample_forward(x, use_conv=False))
    ref_pool = downsample_reference(x, None, False)
    assert out_pool.shape == (N, C, H // 2, W // 2)
    err = float(np.max(np.abs(np.asarray(out_pool) - np.asarray(ref_pool))))
    if not np.allclose(np.asarray(out_pool), np.asarray(ref_pool),
                       atol=1e-5, rtol=1e-5):
        raise AssertionError(f"avg-pool mismatch, max abs err = {err}")

    # --- use_conv=True: 3x3 stride-2 conv (f32 MXU operands) ---
    out_conv = jax.block_until_ready(downsample_forward(x, params, use_conv=True))
    ref_conv = downsample_reference(x, params, True)
    assert out_conv.shape == (N, C, H // 2, W // 2)
    err = float(np.max(np.abs(np.asarray(out_conv) - np.asarray(ref_conv))))
    if not np.allclose(np.asarray(out_conv), np.asarray(ref_conv),
                       atol=1e-2, rtol=1e-2):
        raise AssertionError(f"conv (f32) mismatch, max abs err = {err}")

    # --- use_conv=True with bf16 MXU operands (v6e/v7x fast path), f32 accum ---
    out_bf16 = jax.block_until_ready(
        downsample_forward(x, params, use_conv=True, mxu_dtype=jnp.bfloat16))
    err = float(np.max(np.abs(np.asarray(out_bf16) - np.asarray(ref_conv))))
    if not np.allclose(np.asarray(out_bf16), np.asarray(ref_conv),
                       atol=5e-2, rtol=5e-2):
        raise AssertionError(f"conv (bf16 MXU) mismatch, max abs err = {err}")

    # --- wide-channel case: exercises lane-aligned patch stores + TC tiling
    #     (C=512 -> TC=256, patch scratch reused across channel tiles) ---
    N2, C2, H2, W2 = 1, 512, 8, 8
    k2x, k2w, k2b = jax.random.split(jax.random.PRNGKey(1), 3)
    x2 = jax.random.normal(k2x, (N2, C2, H2, W2), jnp.float32)
    params2 = dict(
        w=0.05 * jax.random.normal(k2w, (C2, C2, 3, 3), jnp.float32),
        b=0.05 * jax.random.normal(k2b, (C2,), jnp.float32),
    )
    out2 = jax.block_until_ready(downsample_forward(x2, params2, use_conv=True))
    ref2 = downsample_reference(x2, params2, True)
    err = float(np.max(np.abs(np.asarray(out2) - np.asarray(ref2))))
    if not np.allclose(np.asarray(out2), np.asarray(ref2), atol=2e-2, rtol=2e-2):
        raise AssertionError(f"conv (C=512, tiled) mismatch, max abs err = {err}")

    print("KERNEL_OK")
</pallas_src>

<mosaic_0001>
module attributes {stable_mosaic.version = 11 : i64} {
  func.func @_avgpool_kernel(%arg0: i32, %arg1: i32, %arg2: memref<4x1x64x4xf32, #tpu.memory_space<vmem>>, %arg3: memref<1x64x4xf32, #tpu.memory_space<vmem>>) attributes {dimension_semantics = [#tpu.dimension_semantics<parallel>, #tpu.dimension_semantics<parallel>], iteration_bounds = array<i64: 2, 1>, scalar_prefetch = 0 : i64, scratch_operands = 0 : i64, tpu.core_type = #tpu.core_type<tc>, window_params = [{transform_indices = @transform_0, window_bounds = array<i64: 4, 1, 64, 4>}, {transform_indices = @transform_1, window_bounds = array<i64: 1, 64, 4>}]} {
    %c0 = arith.constant 0 : index
    %c0_0 = arith.constant 0 : index
    %c0_1 = arith.constant 0 : index
    %c0_2 = arith.constant 0 : index
    %0 = vector.load %arg2[%c0, %c0_0, %c0_1, %c0_2] : memref<4x1x64x4xf32, #tpu.memory_space<vmem>>, vector<1x1x64x4xf32>
    %1 = vector.shape_cast %0 : vector<1x1x64x4xf32> to vector<64x4xf32>
    %c1 = arith.constant 1 : index
    %c0_3 = arith.constant 0 : index
    %c0_4 = arith.constant 0 : index
    %c0_5 = arith.constant 0 : index
    %2 = vector.load %arg2[%c1, %c0_3, %c0_4, %c0_5] : memref<4x1x64x4xf32, #tpu.memory_space<vmem>>, vector<1x1x64x4xf32>
    %3 = vector.shape_cast %2 : vector<1x1x64x4xf32> to vector<64x4xf32>
    %4 = arith.addf %1, %3 : vector<64x4xf32>
    %c2 = arith.constant 2 : index
    %c0_6 = arith.constant 0 : index
    %c0_7 = arith.constant 0 : index
    %c0_8 = arith.constant 0 : index
    %5 = vector.load %arg2[%c2, %c0_6, %c0_7, %c0_8] : memref<4x1x64x4xf32, #tpu.memory_space<vmem>>, vector<1x1x64x4xf32>
    %6 = vector.shape_cast %5 : vector<1x1x64x4xf32> to vector<64x4xf32>
    %7 = arith.addf %4, %6 : vector<64x4xf32>
    %c3 = arith.constant 3 : index
    %c0_9 = arith.constant 0 : index
    %c0_10 = arith.constant 0 : index
    %c0_11 = arith.constant 0 : index
    %8 = vector.load %arg2[%c3, %c0_9, %c0_10, %c0_11] : memref<4x1x64x4xf32, #tpu.memory_space<vmem>>, vector<1x1x64x4xf32>
    %9 = vector.shape_cast %8 : vector<1x1x64x4xf32> to vector<64x4xf32>
    %10 = arith.addf %7, %9 : vector<64x4xf32>
    %cst = arith.constant 2.500000e-01 : f32
    %11 = vector.broadcast %cst : f32 to vector<64x4xf32>
    %12 = arith.mulf %11, %10 : vector<64x4xf32>
    %c0_12 = arith.constant 0 : index
    %c0_13 = arith.constant 0 : index
    %c0_14 = arith.constant 0 : index
    %13 = vector.load %arg3[%c0_12, %c0_13, %c0_14] : memref<1x64x4xf32, #tpu.memory_space<vmem>>, vector<1x64x4xf32>
    %14 = vector.shape_cast %13 : vector<1x64x4xf32> to vector<64x4xf32>
    %15 = vector.shape_cast %12 : vector<64x4xf32> to vector<1x64x4xf32>
    tpu.vector_store %arg3[%c0_12, %c0_13, %c0_14], %15 {strides = array<i32>} : memref<1x64x4xf32, #tpu.memory_space<vmem>>, vector<1x64x4xf32>,
    return
  }
  func.func @transform_0(%arg0: i32, %arg1: i32) -> (i32, i32, i32, i32) {
    %c0_i32 = arith.constant 0 : i32
    %c0_i32_0 = arith.constant 0 : i32
    %c0_i32_1 = arith.constant 0 : i32
    return %c0_i32, %arg0, %arg1, %c0_i32_0 : i32, i32, i32, i32
  }
  func.func @transform_1(%arg0: i32, %arg1: i32) -> (i32, i32, i32) {
    %c0_i32 = arith.constant 0 : i32
    %c0_i32_0 = arith.constant 0 : i32
    return %arg0, %arg1, %c0_i32 : i32, i32, i32
  }
}

</mosaic_0001>

<bundles_post_ra>
// kernel: tpu_custom_call.1
= control target key start
LH: loop header
LB: loop body
LE: loop exit
PB: predicated region body
PF: predicated region fallthrough
CT: control target
= control target key end

     0   :  { %s600_s6 = smov 0   ;;  %s602_s7 = smov 0   ;;  %s786_s0 = inlined_call_operand.vmem [shape: f32[4,2,64,4], index: 0, kind: input, shape index: {}]   ;;  %s787_s1 = inlined_call_operand.vmem [shape: f32[2,64,4], index: 1, kind: output, shape index: {}]  }
   0x1   :  { %s604_s8 = smov 0   ;;  %s606_s9 = smov 0  }
   0x2   :  { %s608_s10 = smov 0  }
   0x3 LB: > { %s23_s11 = sadd.s32 1, %s584_s9  ;;  %p39_p1 = scmp.ne.s32.totalorder %s576_s7, %s572_s6  ;;  %s588_s10 = sphi %s608_s10, %s11_s10   ;;  %s584_s9 = sphi %s606_s9, %s791_s9   ;;  %s580_s8 = sphi %s604_s8, %s790_s8   ;;  %s576_s7 = sphi %s602_s7, %s789_s7   ;;  %s572_s6 = sphi %s600_s6, %s788_s6  }
   0x4   : > { %p25_p0 = scmp.ge.s32.totalorder %s23_s11, 2  ;;  %p40_p2 = scmp.eq.s32.totalorder %s588_s10, 0 }
   0x5   : > { %s32_s13 = sadd.s32 1, %s576_s7  ;;  %p474_p5 = scmp.ge.s32.totalorder %s588_s10, 2 }
   0x6   : > { %s793_s11 = smov (%p25_p0, %s23_s11), 0  ;;  %p41_p3 = por %p40_p2, %p39_p1 }
   0x7   : > { %s27_s12 = ssub.s32 %s584_s9, %s793_s11  ;;  %93 = sbr.rel (%p474_p5) target bundleno = 32 (0x20), region = 16 }
   0x8   : > { %p30_p4 = scmp.eq.s32.totalorder %s27_s12, 0 }
   0xa   : > { %s635_s14 = scalar_select %p30_p4, %s576_s7, %s32_s13  }
   0xc   : > { %96 = sbr.rel (!%p41_p3) target bundleno = 32 (0x20), region = 20  ;;  %s98_s15 = sand.u32 (%p41_p3), 1, %s576_s7  }
   0xd   : > { %s508_s16 = sshll.u32 (%p41_p3), %s584_s9, 6  ;;  %s475_s17 = sshll.u32 (%p41_p3), %s98_s15, 8 }
   0xe   : > { %s643_s20 = scalar_lea.vmem (%p41_p3), %s786_s0, %s508_s16  ;;  %s648_s21 = scalar_lea.vmem (%p41_p3), [#allocation2], %s475_s17 }
   0xf   : > { %v196_v0 = vld [vmem:[%s643_s20] sm:$0xff] (%p41_p3)  ;;  %v198_v1 = vld [vmem:[%s643_s20 + $0x8] sm:$0xff] (%p41_p3)  ;;  %v200_v2 = vld [vmem:[%s643_s20 + $0x10] sm:$0xff] (%p41_p3) }
  0x10   : > { %197 = vst [vmem:[%s648_s21] sm:$0xff] (%p41_p3), %v196_v0  ;;  %199 = vst [vmem:[%s648_s21 + $0x8] sm:$0xff] (%p41_p3), %v198_v1  ;;  %v202_v3 = vld [vmem:[%s643_s20 + $0x18] sm:$0xff] (%p41_p3)  ;;  %v204_v4 = vld [vmem:[%s643_s20 + $0x20] sm:$0xff] (%p41_p3) }
  0x11   : > { %201 = vst [vmem:[%s648_s21 + $0x10] sm:$0xff] %v200_v2  ;;  %v206_v5 = vld [vmem:[%s643_s20 + $0x28] sm:$0xff]  ;;  %203 = vst [vmem:[%s648_s21 + $0x18] sm:$0xff] %v202_v3  ;;  %v208_v6 = vld [vmem:[%s643_s20 + $0x30] sm:$0xff] }
  0x12   : > { %205 = vst [vmem:[%s648_s21 + $0x20] sm:$0xff] %v204_v4  ;;  %207 = vst [vmem:[%s648_s21 + $0x28] sm:$0xff] %v206_v5  ;;  %v210_v7 = vld [vmem:[%s643_s20 + $0x38] sm:$0xff]  ;;  %v212_v8 = vld [vmem:[%s643_s20 + $0x80] sm:$0xff] }
  0x13   : > { %209 = vst [vmem:[%s648_s21 + $0x30] sm:$0xff] %v208_v6  ;;  %211 = vst [vmem:[%s648_s21 + $0x38] sm:$0xff] %v210_v7  ;;  %v214_v9 = vld [vmem:[%s643_s20 + $0x88] sm:$0xff]  ;;  %v216_v10 = vld [vmem:[%s643_s20 + $0x90] sm:$0xff] }
  0x14   : > { %213 = vst [vmem:[%s648_s21 + $0x40] sm:$0xff] %v212_v8  ;;  %v218_v11 = vld [vmem:[%s643_s20 + $0x98] sm:$0xff]  ;;  %215 = vst [vmem:[%s648_s21 + $0x48] sm:$0xff] %v214_v9  ;;  %v220_v12 = vld [vmem:[%s643_s20 + $0xa0] sm:$0xff] }
  0x15   : > { %217 = vst [vmem:[%s648_s21 + $0x50] sm:$0xff] %v216_v10  ;;  %219 = vst [vmem:[%s648_s21 + $0x58] sm:$0xff] %v218_v11  ;;  %v222_v13 = vld [vmem:[%s643_s20 + $0xa8] sm:$0xff]  ;;  %v224_v14 = vld [vmem:[%s643_s20 + $0xb0] sm:$0xff] }
  0x16   : > { %221 = vst [vmem:[%s648_s21 + $0x60] sm:$0xff] %v220_v12  ;;  %223 = vst [vmem:[%s648_s21 + $0x68] sm:$0xff] %v222_v13  ;;  %v226_v15 = vld [vmem:[%s643_s20 + $0xb8] sm:$0xff]  ;;  %v228_v16 = vld [vmem:[%s643_s20 + $0x100] sm:$0xff] }
  0x17   : > { %225 = vst [vmem:[%s648_s21 + $0x70] sm:$0xff] %v224_v14  ;;  %v230_v17 = vld [vmem:[%s643_s20 + $0x108] sm:$0xff]  ;;  %227 = vst [vmem:[%s648_s21 + $0x78] sm:$0xff] %v226_v15  ;;  %v232_v18 = vld [vmem:[%s643_s20 + $0x110] sm:$0xff] }
  0x18   : > { %229 = vst [vmem:[%s648_s21 + $0x80] sm:$0xff] %v228_v16  ;;  %231 = vst [vmem:[%s648_s21 + $0x88] sm:$0xff] %v230_v17  ;;  %v234_v19 = vld [vmem:[%s643_s20 + $0x118] sm:$0xff]  ;;  %v236_v20 = vld [vmem:[%s643_s20 + $0x120] sm:$0xff] }
  0x19   : > { %233 = vst [vmem:[%s648_s21 + $0x90] sm:$0xff] %v232_v18  ;;  %235 = vst [vmem:[%s648_s21 + $0x98] sm:$0xff] %v234_v19  ;;  %v238_v21 = vld [vmem:[%s643_s20 + $0x128] sm:$0xff]  ;;  %v240_v22 = vld [vmem:[%s643_s20 + $0x130] sm:$0xff] }
  0x1a   : > { %237 = vst [vmem:[%s648_s21 + $0xa0] sm:$0xff] %v236_v20  ;;  %v242_v23 = vld [vmem:[%s643_s20 + $0x138] sm:$0xff]  ;;  %239 = vst [vmem:[%s648_s21 + $0xa8] sm:$0xff] %v238_v21  ;;  %v244_v24 = vld [vmem:[%s643_s20 + $0x180] sm:$0xff] }
  0x1b   : > { %241 = vst [vmem:[%s648_s21 + $0xb0] sm:$0xff] %v240_v22  ;;  %243 = vst [vmem:[%s648_s21 + $0xb8] sm:$0xff] %v242_v23  ;;  %v246_v25 = vld [vmem:[%s643_s20 + $0x188] sm:$0xff]  ;;  %v248_v26 = vld [vmem:[%s643_s20 + $0x190] sm:$0xff] }
  0x1c   : > { %245 = vst [vmem:[%s648_s21 + $0xc0] sm:$0xff] %v244_v24  ;;  %247 = vst [vmem:[%s648_s21 + $0xc8] sm:$0xff] %v246_v25  ;;  %v250_v27 = vld [vmem:[%s643_s20 + $0x198] sm:$0xff]  ;;  %v252_v28 = vld [vmem:[%s643_s20 + $0x1a0] sm:$0xff] }
  0x1d   : > { %249 = vst [vmem:[%s648_s21 + $0xd0] sm:$0xff] %v248_v26  ;;  %v254_v29 = vld [vmem:[%s643_s20 + $0x1a8] sm:$0xff]  ;;  %251 = vst [vmem:[%s648_s21 + $0xd8] sm:$0xff] %v250_v27  ;;  %v256_v30 = vld [vmem:[%s643_s20 + $0x1b0] sm:$0xff] }
  0x1e   : > { %253 = vst [vmem:[%s648_s21 + $0xe0] sm:$0xff] %v252_v28  ;;  %255 = vst [vmem:[%s648_s21 + $0xe8] sm:$0xff] %v254_v29  ;;  %v258_v31 = vld [vmem:[%s643_s20 + $0x1b8] sm:$0xff] }
  0x1f   : > { %257 = vst [vmem:[%s648_s21 + $0xf0] sm:$0xff] %v256_v30  ;;  %259 = vst [vmem:[%s648_s21 + $0xf8] sm:$0xff] %v258_v31 }
  0x20 PF: > { %p478_p6 = scmp.ge.s32.totalorder %s588_s10, 1  ;;  %p264_p7 = scmp.lt.s32.totalorder %s588_s10, 3 }
  0x22   : > { %p265_p8 = pnand %p478_p6, %p264_p7 }
  0x23   : > { %s271_s22 = sand.u32 (!%p265_p8), 1, %s572_s6   ;;  %p296_p9 = scmp.lt.s32.totalorder (!%p265_p8), %s580_s8, 1 }
  0x24   : > { %268 = sbr.rel (%p265_p8) target bundleno = 60 (0x3c), region = 58  ;;  %s479_s23 = sshll.u32 (!%p265_p8), %s271_s22, 8 }
  0x25   : > { %s716_s24 = scalar_lea.vmem (!%p265_p8), [#allocation2], %s479_s23 }
  0x29   : > { %s795_s8 = smov (!%p296_p9, %s580_s8), 1  ;;  %v305_v32 = vld [vmem:[%s716_s24] sm:$0xff]  ;;  %v306_v36 = vld [vmem:[%s716_s24 + $0x8] sm:$0xff]  ;;  %v307_v41 = vld [vmem:[%s716_s24 + $0x10] sm:$0xff]  ;;  %vm372_vm0 = vcmask 31744  }
  0x2a   : > { %v482_v33 = vld [vmem:[%s716_s24 + $0x40] sm:$0xff]  ;;  %v483_v37 = vld [vmem:[%s716_s24 + $0x48] sm:$0xff]  ;;  %s509_s25 = sshll.u32 %s795_s8, 6  ;;  %v484_v44 = vld [vmem:[%s716_s24 + $0x50] sm:$0xff] }
  0x2b   : > { %v490_v34 = vld [vmem:[%s716_s24 + $0x80] sm:$0xff]  ;;  %v322_v35 = vadd.f32 %v482_v33, %v305_v32  ;;  %v323_v39 = vadd.f32 %v483_v37, %v306_v36  ;;  %v491_v40 = vld [vmem:[%s716_s24 + $0x88] sm:$0xff]  ;;  %v492_v45 = vld [vmem:[%s716_s24 + $0x90] sm:$0xff]  ;;  %v324_v47 = vadd.f32 %v484_v44, %v307_v41  ;;  %s738_s28 = scalar_lea.vmem %s787_s1, %s509_s25 }
  0x2c   : > { %v498_v38 = vld [vmem:[%s716_s24 + $0xc0] sm:$0xff]  ;;  %v499_v43 = vld [vmem:[%s716_s24 + $0xc8] sm:$0xff]  ;;  %v308_v48 = vld [vmem:[%s716_s24 + $0x18] sm:$0xff] }
  0x2d   : > { %v339_v42 = vadd.f32 %v490_v34, %v322_v35  ;;  %v340_v46 = vadd.f32 %v491_v40, %v323_v39  ;;  %v485_v49 = vld [vmem:[%s716_s24 + $0x58] sm:$0xff]  ;;  %v500_v52 = vld [vmem:[%s716_s24 + $0xd0] sm:$0xff]  ;;  %v309_v54 = vld [vmem:[%s716_s24 + $0x20] sm:$0xff]  ;;  %v341_v57 = vadd.f32 %v492_v45, %v324_v47 }
  0x2e   : > { %v493_v50 = vld [vmem:[%s716_s24 + $0x98] sm:$0xff]  ;;  %v325_v53 = vadd.f32 %v485_v49, %v308_v48  ;;  %v486_v55 = vld [vmem:[%s716_s24 + $0x60] sm:$0xff]  ;;  %v310_v61 = vld [vmem:[%s716_s24 + $0x28] sm:$0xff] }
  0x2f   : > { %v356_v51 = vadd.f32 %v498_v38, %v339_v42  ;;  %v357_v56 = vadd.f32 %v499_v43, %v340_v46  ;;  %v501_v58 = vld [vmem:[%s716_s24 + $0xd8] sm:$0xff]  ;;  %v326_v59 = vadd.f32 %v486_v55, %v309_v54  ;;  %v494_v60 = vld [vmem:[%s716_s24 + $0xa0] sm:$0xff]  ;;  %v487_v1 = vld [vmem:[%s716_s24 + $0x68] sm:$0xff]  ;;  %v358_v4 = vadd.f32 %v500_v52, %v341_v57 }
  0x30   : > { %v342_v63 = vadd.f32 %v493_v50, %v325_v53  ;;  %v502_v0 = vld [vmem:[%s716_s24 + $0xe0] sm:$0xff]  ;;  %v495_v2 = vld [vmem:[%s716_s24 + $0xa8] sm:$0xff]  ;;  %v327_v6 = vadd.f32 %v487_v1, %v310_v61  ;;  %v311_v7 = vld [vmem:[%s716_s24 + $0x30] sm:$0xff] }
  0x31   : > { %v364_v62 = vmul.f32 0.25, %v356_v51  ;;  %v365_v3 = vmul.f32 0.25, %v357_v56  ;;  %v343_v5 = vadd.f32 %v494_v60, %v326_v59  ;;  %v488_v8 = vld [vmem:[%s716_s24 + $0x70] sm:$0xff]  ;;  %v503_v11 = vld [vmem:[%s716_s24 + $0xe8] sm:$0xff]  ;;  %v312_v13 = vld [vmem:[%s716_s24 + $0x38] sm:$0xff]  ;;  %v366_v15 = vmul.f32 0.25, %v358_v4 }
  0x32   : > { %v496_v9 = vld [vmem:[%s716_s24 + $0xb0] sm:$0xff]  ;;  %v359_v10 = vadd.f32 %v501_v58, %v342_v63  ;;  %v328_v12 = vadd.f32 %v488_v8, %v311_v7  ;;  %v489_v14 = vld [vmem:[%s716_s24 + $0x78] sm:$0xff]  ;;  %v344_v17 = vadd.f32 %v495_v2, %v327_v6 }
  0x33   : > { %373 = vst.msk [vmem:[%s738_s28] sm:$0xff] %vm372_vm0, %v364_v62  ;;  %374 = vst.msk [vmem:[%s738_s28 + $0x8] sm:$0xff] %vm372_vm0, %v365_v3  ;;  %v360_v16 = vadd.f32 %v502_v0, %v343_v5  ;;  %v504_v18 = vld [vmem:[%s716_s24 + $0xf0] sm:$0xff]  ;;  %v329_v19 = vadd.f32 %v489_v14, %v312_v13  ;;  %v497_v20 = vld [vmem:[%s716_s24 + $0xb8] sm:$0xff] }
  0x34   : > { %v367_v21 = vmul.f32 0.25, %v359_v10  ;;  %v345_v22 = vadd.f32 %v496_v9, %v328_v12  ;;  %v505_v23 = vld [vmem:[%s716_s24 + $0xf8] sm:$0xff]  ;;  %375 = vst.msk [vmem:[%s738_s28 + $0x10] sm:$0xff] %vm372_vm0, %v366_v15  ;;  %v361_v25 = vadd.f32 %v503_v11, %v344_v17 }
  0x35   : > { %v368_v24 = vmul.f32 0.25, %v360_v16  ;;  %v346_v26 = vadd.f32 %v497_v20, %v329_v19 }
  0x36   : > { %376 = vst.msk [vmem:[%s738_s28 + $0x18] sm:$0xff] %vm372_vm0, %v367_v21  ;;  %v362_v27 = vadd.f32 %v504_v18, %v345_v22  ;;  %v369_v28 = vmul.f32 0.25, %v361_v25 }
  0x37   : > { %377 = vst.msk [vmem:[%s738_s28 + $0x20] sm:$0xff] %vm372_vm0, %v368_v24  ;;  %v363_v29 = vadd.f32 %v505_v23, %v346_v26 }
  0x38   : > { %v370_v30 = vmul.f32 0.25, %v362_v27  ;;  %378 = vst.msk [vmem:[%s738_s28 + $0x28] sm:$0xff] %vm372_vm0, %v369_v28 }
  0x39   : > { %v371_v31 = vmul.f32 0.25, %v363_v29 }
  0x3a   : > { %379 = vst.msk [vmem:[%s738_s28 + $0x30] sm:$0xff] %vm372_vm0, %v370_v30 }
  0x3b   : > { %380 = vst.msk [vmem:[%s738_s28 + $0x38] sm:$0xff] %vm372_vm0, %v371_v31 }
  0x3c PF: > { %s11_s10 = sadd.s32 1, %s588_s10   ;;  %s788_s6 = smov %s576_s7 }
  0x3d   : > { %p8_p10 = scmp.ge.s32.totalorder %s11_s10, 4   ;;  %s789_s7 = smov %s635_s14 }
  0x3e   : > { %s790_s8 = smov %s584_s9  ;;  %s791_s9 = smov %s793_s11 }
  0x3f   :  { %10 = sbr.rel (!%p8_p10) target bundleno = 3 (0x3), region = 100 }

</bundles_post_ra>
